<compile_context>
chip_gen: v7x
topology: tpu7x:2x2x1
jax: 0.10.0
libtpu: 0.0.40
codegen_flags: <defaults>
</compile_context>

<pallas_src>
import functools
import math

import jax
import jax.numpy as jnp
from jax.experimental import pallas as pl
from jax.experimental.pallas import tpu as pltpu


# --------------------------- tiling constants ------------------------------- #

_A_TILE_BUDGET = 8 << 20     # bytes of A (+ output) per grid step (double-buffered)
_MAX_ROW_TILE = 1024         # sublane rows per step; >=512 hits ~85% HBM roofline
_VMEM_HEADROOM = 4 << 20     # Mosaic internal scratch / semaphores slack
_VMEM_FLOOR = 16 << 20
_VMEM_CAP = 56 << 20         # stay below v7x's 64 MiB physical VMEM per TensorCore


# ----------------------------- small helpers -------------------------------- #

def _sublane(dtype):
    return 16 if jnp.dtype(dtype).itemsize == 2 else 8


def _ceil_to(x, m):
    return ((int(x) + m - 1) // m) * m


def _lane_bytes(d, dtype):
    """Bytes of one sublane row of a d-wide operand after 128-lane padding."""
    return _ceil_to(d, 128) * jnp.dtype(dtype).itemsize


def _padded_block_bytes(shape, dtype):
    """VMEM footprint of one buffered block after (sublane, lane) padding."""
    dtype = jnp.dtype(dtype)
    dims = [int(s) for s in shape]
    dims[-1] = _ceil_to(dims[-1], 128)
    if len(dims) >= 2:
        dims[-2] = _ceil_to(dims[-2], _sublane(dtype))
    n = 1
    for d in dims:
        n *= d
    return n * dtype.itemsize


def _clamp_rows(total, t, align):
    """Clamp a row/batch tile: full extent if it covers it, else align-multiple."""
    total = int(total)
    t = max(1, int(t))
    if t >= total or total <= align:
        return total
    return max(align, (t // align) * align)


def _pick_rows(total, per_row_bytes, align, cap=_MAX_ROW_TILE):
    budget_rows = max(1, _A_TILE_BUDGET // max(int(per_row_bytes), 1))
    return _clamp_rows(total, min(cap, budget_rows), align)


def _vmem_limit_bytes(parts):
    total = sum(int(c) * int(b) for c, b in parts) + _VMEM_HEADROOM
    return int(min(max(total, _VMEM_FLOOR), _VMEM_CAP))


def _compiler_params(parts):
    return pltpu.CompilerParams(
        dimension_semantics=("parallel",),
        vmem_limit_bytes=_vmem_limit_bytes(parts))


def _resolve_compute_dtype(compute_dtype):
    if compute_dtype is not None:
        return jnp.dtype(compute_dtype)
    # bf16 pays on v6e/v7x (bf16 MXU + halved weight DMA); accumulation stays
    # f32.  v5e/older keep f32 (no bf16 VPU/EUP, bf16 only buys bandwidth).
    try:
        kind = jax.devices()[0].device_kind.lower()
    except Exception:
        return jnp.dtype(jnp.float32)
    if "v6" in kind or "v7" in kind:
        return jnp.dtype(jnp.bfloat16)
    return jnp.dtype(jnp.float32)


# ------------------ single-buffered constant-weight blocks ------------------ #

_SINGLE_BUFFER_OK = None


def _single_buffer_supported():
    """Probe (once) whether pipeline_mode=pl.Buffered(1) compiles & runs here."""
    global _SINGLE_BUFFER_OK
    if _SINGLE_BUFFER_OK is not None:
        return _SINGLE_BUFFER_OK
    try:
        def probe_kernel(x_ref, w_ref, o_ref):
            o_ref[...] = x_ref[...] + w_ref[...]

        x = jnp.arange(16 * 128, dtype=jnp.float32).reshape(16, 128)
        w = jnp.full((8, 128), 3.0, jnp.float32)
        out = pl.pallas_call(
            probe_kernel,
            out_shape=jax.ShapeDtypeStruct((16, 128), jnp.float32),
            grid=(2,),
            in_specs=[pl.BlockSpec((8, 128), lambda i: (i, 0)),
                      pl.BlockSpec((8, 128), lambda i: (0, 0),
                                   pipeline_mode=pl.Buffered(1))],
            out_specs=pl.BlockSpec((8, 128), lambda i: (i, 0)),
        )(x, w)
        _SINGLE_BUFFER_OK = bool(jnp.allclose(jax.block_until_ready(out), x + 3.0))
    except Exception:  # any construction / lowering failure -> double-buffer
        _SINGLE_BUFFER_OK = False
    return _SINGLE_BUFFER_OK


def _const_weight_spec(shape):
    """BlockSpec for a grid-constant weight operand (1-D grid).

    Constant-index blocks never change across the grid, so double-buffering
    them only doubles their VMEM cost; single-buffer when supported.
    """
    nd = len(shape)
    index_map = lambda i: (0,) * nd  # noqa: E731
    if _single_buffer_supported():
        return pl.BlockSpec(shape, index_map, pipeline_mode=pl.Buffered(1))
    return pl.BlockSpec(shape, index_map)


# ----------------------------- kernels -------------------------------------- #

def _0_to_0_kernel(x_ref, w_ref, o_ref, *, compute_dtype):
    # x_ref: (Mt, D_in), w_ref: (D_in, D_out), o_ref: (Mt, D_out).
    # Cast in-kernel (post-load): free on the VPU slot and avoids the extra
    # full HBM pass a wrapper-side astype would cost.
    x = x_ref[...].astype(compute_dtype)
    o_ref[...] = jnp.dot(x, w_ref[...],
                         preferred_element_type=jnp.float32).astype(o_ref.dtype)


def _1_to_0_kernel(a_ref, w_ref, o_ref, *, compute_dtype):
    # a_ref: (Bt, N, D_in) -- padded node rows are exactly zero, so the plain
    # sum over the node axis equals the masked sum (hot_pytorch B invariant).
    # Node-axis reduction is done in f32 regardless of compute_dtype.
    a1 = jnp.sum(a_ref[...].astype(jnp.float32), axis=1)            # (Bt, D_in)
    o_ref[...] = jnp.dot(a1.astype(compute_dtype), w_ref[...],
                         preferred_element_type=jnp.float32).astype(o_ref.dtype)


def _1_to_1_default_kernel(a_ref, w12_ref, w2_ref, o_ref, *, compute_dtype):
    # Equivariant basis for (1 -> 1), cfg='default':
    #   out[b,i] = A[b,i] @ W1 + (sum_{j != i} A[b,j]) @ W2
    #            = A[b,i] @ (W1 - W2) + (sum_j A[b,j]) @ W2
    # W1-W2 is prefolded in the wrapper; padded node rows of A are zero.
    bt, n, d_in = a_ref.shape
    a = a_ref[...]
    total = jnp.sum(a.astype(jnp.float32), axis=1)                  # f32 reduction
    a_c = a.astype(compute_dtype)
    # NOTE: the reshape is layout-preserving when N is a multiple of the
    # sublane pack (8 f32 / 16 bf16); otherwise Mosaic inserts a VMEM copy
    # (perf only, never correctness).
    main = jnp.dot(a_c.reshape(bt * n, d_in), w12_ref[...],
                   preferred_element_type=jnp.float32)              # (Bt*N, D_out)
    corr = jnp.dot(total.astype(compute_dtype), w2_ref[...],
                   preferred_element_type=jnp.float32)              # (Bt, D_out)
    out = main.reshape(bt, n, -1) + corr[:, None, :]
    o_ref[...] = out.astype(o_ref.dtype)


# --------------------------- pallas wrappers --------------------------------- #

def weight_0_to_0(x, w, *, block_m=None, compute_dtype=None, out_dtype=jnp.float32):
    compute_dtype = _resolve_compute_dtype(compute_dtype)
    M, d_in = x.shape
    d_out = w.shape[1]
    w = w.astype(compute_dtype)                       # tiny, once per call
    align = max(_sublane(x.dtype), _sublane(out_dtype))
    per_row = _lane_bytes(d_in, x.dtype) + _lane_bytes(d_out, out_dtype)
    bm = (_clamp_rows(M, block_m, align) if block_m is not None
          else _pick_rows(M, per_row, align))
    w_bufs = 1 if _single_buffer_supported() else 2
    parts = [(2, _padded_block_bytes((bm, d_in), x.dtype)),
             (w_bufs, _padded_block_bytes((d_in, d_out), compute_dtype)),
             (2, _padded_block_bytes((bm, d_out), out_dtype))]
    return pl.pallas_call(
        functools.partial(_0_to_0_kernel, compute_dtype=compute_dtype),
        out_shape=jax.ShapeDtypeStruct((M, d_out), out_dtype),
        grid=(pl.cdiv(M, bm),),
        in_specs=[pl.BlockSpec((bm, d_in), lambda i: (i, 0)),
                  _const_weight_spec((d_in, d_out))],
        out_specs=pl.BlockSpec((bm, d_out), lambda i: (i, 0)),
        compiler_params=_compiler_params(parts),
    )(x, w)


def weight_1_to_0(A, w, *, block_b=None, compute_dtype=None, out_dtype=jnp.float32):
    compute_dtype = _resolve_compute_dtype(compute_dtype)
    B, N, d_in = A.shape
    d_out = w.shape[1]
    w = w.astype(compute_dtype)
    align = _sublane(out_dtype)   # bt is the sublane dim of the (Bt, D_out) out block
    per_batch = N * _lane_bytes(d_in, A.dtype) + _lane_bytes(d_out, out_dtype)
    bt = (_clamp_rows(B, block_b, align) if block_b is not None
          else _pick_rows(B, per_batch, align))
    w_bufs = 1 if _single_buffer_supported() else 2
    parts = [(2, _padded_block_bytes((bt, N, d_in), A.dtype)),
             (w_bufs, _padded_block_bytes((d_in, d_out), compute_dtype)),
             (2, _padded_block_bytes((bt, d_out), out_dtype))]
    return pl.pallas_call(
        functools.partial(_1_to_0_kernel, compute_dtype=compute_dtype),
        out_shape=jax.ShapeDtypeStruct((B, d_out), out_dtype),
        grid=(pl.cdiv(B, bt),),
        in_specs=[pl.BlockSpec((bt, N, d_in), lambda i: (i, 0, 0)),
                  _const_weight_spec((d_in, d_out))],
        out_specs=pl.BlockSpec((bt, d_out), lambda i: (i, 0)),
        compiler_params=_compiler_params(parts),
    )(A, w)


def weight_1_to_1_default(A, w, *, block_b=None, compute_dtype=None,
                          out_dtype=jnp.float32):
    compute_dtype = _resolve_compute_dtype(compute_dtype)
    B, N, d_in = A.shape
    d_out = w.shape[1]
    # Prefold W1 - W2 once (O(D_in*D_out)); the kernel then needs one big
    # (Bt*N, D_in) @ (D_in, D_out) matmul plus a tiny broadcast correction.
    w12 = (w[:d_in, :] - w[d_in:, :]).astype(compute_dtype)
    w2 = w[d_in:, :].astype(compute_dtype)
    align = 8                    # bt is a leading (non-sublane) dim; 8 keeps folded rows tidy
    per_batch = N * (_lane_bytes(d_in, A.dtype) + _lane_bytes(d_out, out_dtype))
    cap = max(align, _MAX_ROW_TILE // max(N, 1))   # ~1024 folded matmul rows / step
    bt = (_clamp_rows(B, block_b, align) if block_b is not None
          else _pick_rows(B, per_batch, align, cap=cap))
    w_bufs = 1 if _single_buffer_supported() else 2
    parts = [(2, _padded_block_bytes((bt, N, d_in), A.dtype)),
             (2 * w_bufs, _padded_block_bytes((d_in, d_out), compute_dtype)),
             (2, _padded_block_bytes((bt, N, d_out), out_dtype))]
    return pl.pallas_call(
        functools.partial(_1_to_1_default_kernel, compute_dtype=compute_dtype),
        out_shape=jax.ShapeDtypeStruct((B, N, d_out), out_dtype),
        grid=(pl.cdiv(B, bt),),
        in_specs=[pl.BlockSpec((bt, N, d_in), lambda i: (i, 0, 0)),
                  _const_weight_spec((d_in, d_out)),
                  _const_weight_spec((d_in, d_out))],
        out_specs=pl.BlockSpec((bt, N, d_out), lambda i: (i, 0, 0)),
        compiler_params=_compiler_params(parts),
    )(A, w12, w2)


# ------------------------------ module --------------------------------------- #

_N_W_TABLE = {
    (0, 0): {'default': 1, 'light': 1},
    (1, 0): {'default': 1, 'light': 1},
    (1, 1): {'default': 2, 'light': 1},
    (1, 2): {'default': 5, 'light': 3},
    (2, 0): {'default': 2, 'light': 2},
    (2, 1): {'default': 5, 'light': 1},
    (2, 2): {'default': 15, 'light': 5},
}


class WeightDense:
    """JAX/Pallas port of hot_pytorch dense _Weight (subset of order combos).

    Relies on the hot_pytorch invariant that padded node rows of A are exactly
    zero; the node-mask argument is accepted for API compatibility but is not
    DMA'd into the kernels.

    compute_dtype=None auto-selects bf16 on v6e/v7x (MXU accumulation and the
    node-axis reductions stay f32) and f32 on v5e/older.  Pass bf16 A from the
    caller to additionally halve the A DMA bytes.
    """

    def __init__(self, ord_in, ord_out, dim_in, dim_out,
                 cfg='default', normalize=False, key=None,
                 compute_dtype=None, out_dtype=jnp.float32):
        assert cfg in ('default', 'light')
        if normalize:
            # TODO(synk): normalize=True (divide by n_nodes / per-row valid count).
            raise NotImplementedError("normalize=True not implemented")
        self.ord_in, self.ord_out = ord_in, ord_out
        self.cfg, self.normalize = cfg, normalize
        self.compute_dtype = compute_dtype
        self.out_dtype = out_dtype
        n_w = _N_W_TABLE[(ord_in, ord_out)][cfg]
        fan_in, fan_out = dim_in * n_w, dim_out
        std = math.sqrt(2.0 / (fan_in + fan_out))   # xavier_normal_
        key = jax.random.PRNGKey(0) if key is None else key
        self.weight = std * jax.random.normal(key, (fan_in, fan_out), jnp.float32)

    def __call__(self, A, mask=None):
        kw = dict(compute_dtype=self.compute_dtype, out_dtype=self.out_dtype)
        if (self.ord_in, self.ord_out) == (0, 0):
            return weight_0_to_0(A, self.weight, **kw)
        if (self.ord_in, self.ord_out) == (1, 0):
            return weight_1_to_0(A, self.weight, **kw)
        if (self.ord_in, self.ord_out) == (1, 1):
            if self.cfg == 'light':
                B, N, _ = A.shape
                out = weight_0_to_0(A.reshape(B * N, A.shape[-1]), self.weight, **kw)
                return out.reshape(B, N, -1)
            return weight_1_to_1_default(A, self.weight, **kw)
        # TODO(synk): (1,2), (2,0), (2,1), (2,2) need the order-2 diag/nondiag basis.
        raise NotImplementedError(
            f"(ord_in, ord_out)=({self.ord_in},{self.ord_out}) not implemented")


# ----------------------------- references ------------------------------------ #

def _ref_0_to_0(x, w):
    return x @ w


def _ref_1_to_0(A, w):
    return A.sum(1) @ w


def _ref_1_to_1_default(A, mask_f, w):
    am = A * mask_f[..., None]
    a2 = am.sum(1, keepdims=True) - am
    return jnp.concatenate([A, a2], axis=-1) @ w


# -------------------------------- main ---------------------------------------- #

if __name__ == "__main__":
    key = jax.random.PRNGKey(0)
    k_a, k_x, k_w0, k_w1, k_w2, k_a2, k_x2 = jax.random.split(key, 7)

    Bsz, N, D_in, D_out = 2, 8, 32, 32
    f32 = jnp.float32

    # --- small config (blocks == full arrays) -------------------------------- #
    A = jax.random.normal(k_a, (Bsz, N, D_in), f32)
    n_nodes = jnp.array([8, 6], jnp.int32)
    mask = (jnp.arange(N)[None, :] < n_nodes[:, None]).astype(f32)
    A = A * mask[..., None]          # padded rows zeroed, as in hot_pytorch

    x = jax.random.normal(k_x, (Bsz, D_in), f32)

    mod_00 = WeightDense(0, 0, D_in, D_out, key=k_w0, compute_dtype=f32)
    mod_10 = WeightDense(1, 0, D_in, D_out, key=k_w1, compute_dtype=f32)
    mod_11 = WeightDense(1, 1, D_in, D_out, cfg='default', key=k_w2, compute_dtype=f32)
    mod_11_light = WeightDense(1, 1, D_in, D_out, cfg='light', key=k_w2,
                               compute_dtype=f32)

    y00 = jax.block_until_ready(mod_00(x))
    y10 = jax.block_until_ready(mod_10(A))
    y11 = jax.block_until_ready(mod_11(A, mask))
    y11l = jax.block_until_ready(mod_11_light(A, mask))

    r00 = _ref_0_to_0(x, mod_00.weight)
    r10 = _ref_1_to_0(A, mod_10.weight)
    r11 = _ref_1_to_1_default(A, mask, mod_11.weight)
    r11l = A @ mod_11_light.weight

    assert y00.shape == (Bsz, D_out)
    assert y10.shape == (Bsz, D_out)
    assert y11.shape == (Bsz, N, D_out)
    assert y11l.shape == (Bsz, N, D_out)
    assert jnp.allclose(y00, r00, atol=1e-4, rtol=1e-4)
    assert jnp.allclose(y10, r10, atol=1e-4, rtol=1e-4)
    assert jnp.allclose(y11, r11, atol=1e-4, rtol=1e-4)
    assert jnp.allclose(y11l, r11l, atol=1e-4, rtol=1e-4)

    # --- larger config exercising the batch-tiled grid (grid > 1) ------------ #
    B2 = 16
    A2 = jax.random.normal(k_a2, (B2, N, D_in), f32)
    n_nodes2 = jnp.concatenate([jnp.full((8,), 8, jnp.int32),
                                jnp.full((8,), 5, jnp.int32)])
    mask2 = (jnp.arange(N)[None, :] < n_nodes2[:, None]).astype(f32)
    A2 = A2 * mask2[..., None]
    x2 = jax.random.normal(k_x2, (B2, D_in), f32)

    y00b = jax.block_until_ready(
        weight_0_to_0(x2, mod_00.weight, block_m=8, compute_dtype=f32))
    y10b = jax.block_until_ready(
        weight_1_to_0(A2, mod_10.weight, block_b=8, compute_dtype=f32))
    y11b = jax.block_until_ready(
        weight_1_to_1_default(A2, mod_11.weight, block_b=8, compute_dtype=f32))

    assert jnp.allclose(y00b, _ref_0_to_0(x2, mod_00.weight), atol=1e-4, rtol=1e-4)
    assert jnp.allclose(y10b, _ref_1_to_0(A2, mod_10.weight), atol=1e-4, rtol=1e-4)
    assert jnp.allclose(y11b, _ref_1_to_1_default(A2, mask2, mod_11.weight),
                        atol=1e-4, rtol=1e-4)

    # --- hardware-default compute dtype (bf16 on v6e/v7x, f32 elsewhere) ----- #
    mod_11_auto = WeightDense(1, 1, D_in, D_out, cfg='default', key=k_w2)
    y11a = jax.block_until_ready(mod_11_auto(A, mask))
    assert y11a.shape == (Bsz, N, D_out)
    assert float(jnp.max(jnp.abs(y11a - r11))) < 0.25

    # --- explicit bf16 compute path (f32 reductions + f32 MXU accumulation) -- #
    y11_bf16 = jax.block_until_ready(
        weight_1_to_1_default(A, mod_11.weight, compute_dtype=jnp.bfloat16))
    assert float(jnp.max(jnp.abs(y11_bf16 - r11))) < 0.25

    print("KERNEL_OK")
</pallas_src>

<mosaic_0001>
module attributes {stable_mosaic.version = 11 : i64} {
  func.func @probe_kernel(%arg0: i32, %arg1: memref<8x128xf32, #tpu.memory_space<vmem>>, %arg2: memref<8x128xf32, #tpu.memory_space<vmem>>, %arg3: memref<8x128xf32, #tpu.memory_space<vmem>>) attributes {dimension_semantics = [#tpu.dimension_semantics<arbitrary>], iteration_bounds = array<i64: 2>, scalar_prefetch = 0 : i64, scratch_operands = 0 : i64, tpu.core_type = #tpu.core_type<tc>, window_params = [{transform_indices = @transform_0, window_bounds = array<i64: 8, 128>}, {pipeline_mode = #tpu.pipeline_mode<synchronous>, transform_indices = @transform_1, window_bounds = array<i64: 8, 128>}, {transform_indices = @transform_2, window_bounds = array<i64: 8, 128>}]} {
    %c0 = arith.constant 0 : index
    %c0_0 = arith.constant 0 : index
    %0 = vector.load %arg1[%c0, %c0_0] : memref<8x128xf32, #tpu.memory_space<vmem>>, vector<8x128xf32>
    %c0_1 = arith.constant 0 : index
    %c0_2 = arith.constant 0 : index
    %1 = vector.load %arg2[%c0_1, %c0_2] : memref<8x128xf32, #tpu.memory_space<vmem>>, vector<8x128xf32>
    %2 = arith.addf %0, %1 : vector<8x128xf32>
    %c0_3 = arith.constant 0 : index
    %c0_4 = arith.constant 0 : index
    %3 = vector.load %arg3[%c0_3, %c0_4] : memref<8x128xf32, #tpu.memory_space<vmem>>, vector<8x128xf32>
    tpu.vector_store %arg3[%c0_3, %c0_4], %2 {strides = array<i32>} : memref<8x128xf32, #tpu.memory_space<vmem>>, vector<8x128xf32>,
    return
  }
  func.func @transform_0(%arg0: i32) -> (i32, i32) {
    %c0_i32 = arith.constant 0 : i32
    %c0_i32_0 = arith.constant 0 : i32
    return %arg0, %c0_i32 : i32, i32
  }
  func.func @transform_1(%arg0: i32) -> (i32, i32) {
    %c0_i32 = arith.constant 0 : i32
    %c0_i32_0 = arith.constant 0 : i32
    %c0_i32_1 = arith.constant 0 : i32
    return %c0_i32, %c0_i32_0 : i32, i32
  }
  func.func @transform_2(%arg0: i32) -> (i32, i32) {
    %c0_i32 = arith.constant 0 : i32
    %c0_i32_0 = arith.constant 0 : i32
    return %arg0, %c0_i32 : i32, i32
  }
}

module attributes {stable_mosaic.version = 11 : i64} {
  func.func @_0_to_0_kernel(%arg0: i32, %arg1: memref<2x32xf32, #tpu.memory_space<vmem>>, %arg2: memref<32x32xf32, #tpu.memory_space<vmem>>, %arg3: memref<2x32xf32, #tpu.memory_space<vmem>>) attributes {dimension_semantics = [#tpu.dimension_semantics<parallel>], iteration_bounds = array<i64: 1>, scalar_prefetch = 0 : i64, scratch_operands = 0 : i64, tpu.core_type = #tpu.core_type<tc>, window_params = [{transform_indices = @transform_0, window_bounds = array<i64: 2, 32>}, {pipeline_mode = #tpu.pipeline_mode<synchronous>, transform_indices = @transform_1, window_bounds = array<i64: 32, 32>}, {transform_indices = @transform_2, window_bounds = array<i64: 2, 32>}]} {
    %c0 = arith.constant 0 : index
    %c0_0 = arith.constant 0 : index
    %0 = vector.load %arg1[%c0, %c0_0] : memref<2x32xf32, #tpu.memory_space<vmem>>, vector<2x32xf32>
    %c0_1 = arith.constant 0 : index
    %c0_2 = arith.constant 0 : index
    %1 = vector.load %arg2[%c0_1, %c0_2] : memref<32x32xf32, #tpu.memory_space<vmem>>, vector<32x32xf32>
    %cst = arith.constant dense<0.000000e+00> : vector<2x32xf32>
    %2 = tpu.matmul %0, %1, %cst {dimension_numbers = #tpu.dot_dimension_numbers<[1], [0], [0], [1], [0, 0, 1, 1], [], []>} : vector<2x32xf32>, vector<32x32xf32>, vector<2x32xf32> -> vector<2x32xf32>
    %c0_3 = arith.constant 0 : index
    %c0_4 = arith.constant 0 : index
    %3 = vector.load %arg3[%c0_3, %c0_4] : memref<2x32xf32, #tpu.memory_space<vmem>>, vector<2x32xf32>
    tpu.vector_store %arg3[%c0_3, %c0_4], %2 {strides = array<i32>} : memref<2x32xf32, #tpu.memory_space<vmem>>, vector<2x32xf32>,
    return
  }
  func.func @transform_0(%arg0: i32) -> (i32, i32) {
    %c0_i32 = arith.constant 0 : i32
    %c0_i32_0 = arith.constant 0 : i32
    return %arg0, %c0_i32 : i32, i32
  }
  func.func @transform_1(%arg0: i32) -> (i32, i32) {
    %c0_i32 = arith.constant 0 : i32
    %c0_i32_0 = arith.constant 0 : i32
    %c0_i32_1 = arith.constant 0 : i32
    return %c0_i32, %c0_i32_0 : i32, i32
  }
  func.func @transform_2(%arg0: i32) -> (i32, i32) {
    %c0_i32 = arith.constant 0 : i32
    %c0_i32_0 = arith.constant 0 : i32
    return %arg0, %c0_i32 : i32, i32
  }
}

</mosaic_0001>

<bundles_post_ra>
// kernel: tpu_custom_call.1
= control target key start
LH: loop header
LB: loop body
LE: loop exit
PB: predicated region body
PF: predicated region fallthrough
CT: control target
= control target key end

     0   :  { %7 = vsyncpa [#allocation3], 0  ;;  %s690_s0 = inlined_call_operand.hbm [shape: f32[16,128], index: 0, kind: input, shape index: {}]   ;;  %s691_s1 = inlined_call_operand.hbm [shape: f32[8,128], index: 1, kind: input, shape index: {}]   ;;  %s692_s2 = inlined_call_operand.hbm [shape: f32[16,128], index: 2, kind: output, shape index: {}]  }
   0x1   :  { %9 = vsyncpa [#allocation3 + $0x1], 0 }
   0x2   :  { %10 = vsyncpa [#allocation6], 0 }
   0x3   :  { %11 = vsyncpa [#allocation4], 0 }
   0x4   :  { %13 = vsyncpa [#allocation4 + $0x1], 0  ;;  %s489_s9 = smov 0   ;;  %s491_s10 = smov 0  }
   0x5   :  { %s493_s11 = smov 0   ;;  %s495_s12 = smov 0  }
   0x6 LB: > { %s510_s13 = sadd.s32 4294967295, %s469_s12   ;;  %s270_s14 = sadd.s32 4294967294, %s469_s12   ;;  %s469_s12 = sphi %s495_s12, %s716_s12   ;;  %s465_s11 = sphi %s493_s11, %s715_s11   ;;  %s461_s10 = sphi %s491_s10, %s714_s10   ;;  %s457_s9 = sphi %s489_s9, %s713_s9  }
   0x7   : > { %p39_p0 = scmp.ne.s32.totalorder %s461_s10, %s457_s9  ;;  %p693_p1 = scmp.eq.s32.totalorder %s510_s13, 0 }
   0x8   : > { %p90_p3 = scmp.eq.s32.totalorder %s270_s14, 1  ;;  %p271_p5 = scmp.ge.s32.totalorder %s469_s12, 1 }
   0x9   : > { %p519_p4 = por %p693_p1, %p39_p0  ;;  %p97_p7 = scmp.lt.s32.totalorder %s469_s12, 3 }
   0xa   : > { %p524_p6 = por %p90_p3, %p39_p0  ;;  %s471_s18 = smov [#allocation5]  }
   0xb   : > { %s696_s15 = scalar_select %p519_p4, 1, 0 }
   0xc   : > { %s697_s16 = scalar_select %p524_p6, 1, 0 }
   0xd   : > { %p529_p8 = pnand %p271_p5, %p97_p7  ;;  %s110_s19 = sshll.u32 %s471_s18, 4  ;;  %s111_s19 = int_to_ptr.vmem [resolvable:$true] %s110_s19 }
   0xe   : > { %s537_s20 = sadd.s32 1, %s469_s12   ;;  %s26_s24 = sadd.s32 1, %s465_s11 }
   0xf   : > { %s698_s17 = scalar_select %p529_p8, 1, 0 }
  0x10   : > { %p292_p10 = pneg %p529_p8  ;;  %s23_s22 = ssub.s32 %s469_s12, %s537_s20 }
  0x11   : > { %p547_p12 = scmp.eq.s32.totalorder %s23_s22, 0  ;;  %s341_s27 = scalar_lea.hbm %s691_s1, 128 }
  0x12   : > { %p541_p11 = pnand %p292_p10, %p693_p1  ;;  %p342_p0 = scmp.ne.s32.totalorder %s691_s1, %s341_s27 }
  0x13   : > { %s700_s23 = scalar_select %p547_p12, 1, 0 }
  0x14   : > { %p343_p3 = pneg %p541_p11  ;;  %p348_p10 = scmp.lt.u32.totalorder %s341_s27, %s691_s1 }
  0x16   : > { %p344_p5 = pnand %p343_p3, %p342_p0 }
  0x18   : > { %p345_p7 = pneg %p344_p5 }
  0x1a   : > { %p350_p9 = pnand %p348_p10, %p345_p7 }
  0x1c   : > { %353 = shalt.err (!%p350_p9)
}
  0x1d   : > { %s354_s4 = scalar_lea.vmem %s111_s19, 128  ;;  %p362_p6 = scmp.lt.s32.totalorder %s111_s19, %s111_s19 }
  0x1e   : > { %p355_p1 = scmp.ne.s32.totalorder %s111_s19, %s354_s4  ;;  %p363_p4 = scmp.lt.s32.totalorder %s354_s4, %s354_s4 }
  0x20   : > { %p357_p2 = pnand %p355_p1, %p343_p3  ;;  %p364_p8 = por %p363_p4, %p362_p6 }
  0x22   : > { %p358_p13 = pneg %p357_p2 }
  0x24   : > { %p365_p12 = pnand %p364_p8, %p358_p13 }
  0x26   : > { %368 = shalt.err (!%p365_p12)
}
  0x27   : > { %295 = dma.hbm_to_vmem [thread:$0]  (!%p541_p11), %s691_s1, 128, %s111_s19, [#allocation6]  }
  0x28   : > { %p701_p1 = scmp.ne.s32.totalorder %s700_s23, 0  ;;  %p34_p2 = scmp.eq.s32.totalorder %s469_s12, 0 }
  0x29   : > { %p702_p4 = scmp.ne.s32.totalorder %s465_s11, %s461_s10  ;;  %p703_p6 = scmp.eq.s32.totalorder %s510_s13, 1 }
  0x2a   : > { %s573_s7 = scalar_select %p701_p1, %s465_s11, %s26_s24  }
  0x2b   : > { %p581_p8 = por %p703_p6, %p702_p4  ;;  %p305_p9 = scmp.lt.s32.totalorder %s469_s12, 2 }
  0x2c   : > { %s121_s14 = sand.u32 1, %s465_s11   ;;  %p705_p12 = pmov %p702_p4 }
  0x2d   : > { %s274_s18 = sshll.u32 %s121_s14, 3  ;;  %s275_s21 = sshll.u32 %s469_s12, 7 }
  0x2e   : > { %p35_p13 = por %p34_p2, %p705_p12  ;;  %s594_s19 = scalar_lea.hbm %s690_s0, %s275_s21 }
  0x2f   : > { %s125_s23 = scalar_lea.vmem [#allocation2], %s274_s18  ;;  %s122_s27 = scalar_lea.sflag [#allocation3], %s121_s14 }
  0x30   : > { %s132_s24 = sshll.u32 %s125_s23, 4  ;;  %p596_p11 = pnand %p305_p9, %p35_p13  ;;  %s600_s24 = int_to_ptr.vmem [resolvable:$true] %s132_s24 }
  0x31   : > { %s369_s28 = scalar_lea.hbm %s594_s19, 128  ;;  %s374_s3 = scalar_lea.hbm %s690_s0, 256 }
  0x32   : > { %p370_p0 = scmp.ne.s32.totalorder %s594_s19, %s369_s28  ;;  %p371_p3 = pneg %p596_p11 }
  0x33   : > { %p375_p10 = scmp.lt.u32.totalorder %s594_s19, %s690_s0  ;;  %p376_p1 = scmp.lt.u32.totalorder %s374_s3, %s369_s28 }
  0x34   : > { %p372_p5 = pnand %p371_p3, %p370_p0  ;;  %p378_p4 = scmp.lt.u32.totalorder %s369_s28, %s594_s19 }
  0x35   : > { %p377_p2 = por %p376_p1, %p375_p10 }
  0x36   : > { %p373_p7 = pneg %p372_p5 }
  0x37   : > { %p379_p6 = por %p378_p4, %p377_p2 }
  0x39   : > { %p380_p9 = pnand %p379_p6, %p373_p7 }
  0x3b   : > { %383 = shalt.err (!%p380_p9)
}
  0x3c   : > { %s384_s6 = scalar_lea.vmem %s600_s24, 128  ;;  %s472_s14 = smov [#allocation2]  }
  0x3d   : > { %p385_p12 = scmp.ne.s32.totalorder %s600_s24, %s384_s6  ;;  %s389_s18 = sshll.u32 %s472_s14, 4  ;;  %s390_s18 = int_to_ptr.vmem [resolvable:$false] %s389_s18 }
  0x3e   : > { %s391_s21 = scalar_lea.vmem %s390_s18, 256  ;;  %p392_p5 = scmp.lt.s32.totalorder %s600_s24, %s390_s18 }
  0x3f   : > { %p387_p13 = pnand %p385_p12, %p371_p3  ;;  %p393_p10 = scmp.lt.s32.totalorder %s391_s21, %s384_s6 }
  0x41   : > { %p388_p0 = pneg %p387_p13  ;;  %p394_p1 = por %p393_p10, %p392_p5 }
  0x43   : > { %p395_p2 = pnand %p394_p1, %p388_p0 }
  0x45   : > { %398 = shalt.err (!%p395_p2)
}
  0x46   : > { %299 = dma.hbm_to_vmem [thread:$0]  (!%p596_p11), %s594_s19, 128, %s600_s24, %s122_s27  }
  0x47   : > { %p707_p7 = scmp.ne.s32.totalorder %s698_s17, 0 }
  0x48   : > { %s630_s22 = sand.u32 (!%p707_p7), 1, %s461_s10   ;;  %p708_p3 = scmp.ne.s32.totalorder (!%p707_p7), %s696_s15, 0 }
  0x49   : > { %141 = sbr.rel (%p707_p7) target bundleno = 109 (0x6d), region = 28  ;;  %s277_s25 = sshll.u32 (!%p707_p7), %s630_s22, 3 }
  0x4a   : > { %s144_s23 = scalar_lea.sflag (!%p707_p7), [#allocation3], %s630_s22  ;;  %s147_s28 = scalar_lea.vmem (!%p707_p7), [#allocation2], %s277_s25 }
  0x50   : > { %444 = dma.done.wait (%p708_p3), %s144_s23, 128  }
  0x51   : > { %446 = vsyncadd (%p708_p3), %s144_s23, 4294967168  ;;  %p709_p4 = scmp.eq.s32.totalorder %s510_s13, 0 }
  0x53   : > { %448 = dma.done.wait (%p709_p4), [#allocation6], 128   ;;  %p710_p11 = pmov %p709_p4 }
  0x54   : > { %s171_s17 = scalar_lea.vmem [#allocation7], %s277_s25  ;;  %s281_s24 = sshll.u32 %s510_s13, 7  ;;  %v172_v0 = vld [vmem:[%s147_s28] sm:$0xff]  ;;  %v173_v1 = vld [vmem:[#allocation5] sm:$0xff] }
  0x55   : > { %450 = vsyncadd (%p710_p11), [#allocation6], 4294967168  ;;  %s190_s19 = sshll.u32 %s171_s17, 4  ;;  %v174_v2 = vadd.f32 %v173_v1, %v172_v0  ;;  %s648_s27 = scalar_lea.hbm %s692_s2, %s281_s24  ;;  %s643_s19 = int_to_ptr.vmem [resolvable:$true] %s190_s19 }
  0x56   : > { %s177_s29 = scalar_lea.sflag [#allocation4], %s630_s22  ;;  %s399_s30 = scalar_lea.vmem %s643_s19, 128 }
  0x57   : > { %175 = vst [vmem:[%s171_s17] sm:$0xff] %v174_v2  ;;  %p400_p6 = scmp.ne.s32.totalorder %s643_s19, %s399_s30  ;;  %s473_s13 = smov [#allocation7]  }
  0x58   : > { %s403_s3 = sshll.u32 %s473_s13, 4  ;;  %s404_s3 = int_to_ptr.vmem [resolvable:$false] %s403_s3 }
  0x59   : > { %p401_p9 = pnand %p400_p6, %p581_p8  ;;  %s405_s4 = scalar_lea.vmem %s404_s3, 256 }
  0x5a   : > { %p406_p13 = scmp.lt.s32.totalorder %s643_s19, %s404_s3  ;;  %p407_p0 = scmp.lt.s32.totalorder %s405_s4, %s399_s30 }
  0x5b   : > { %p402_p12 = pneg %p401_p9 }
  0x5c   : > { %p408_p5 = por %p407_p0, %p406_p13 }
  0x5e   : > { %p409_p10 = pnand %p408_p5, %p402_p12 }
  0x60   : > { %412 = shalt.err (!%p409_p10)
}
  0x61   : > { %s413_s5 = scalar_lea.hbm %s648_s27, 128  ;;  %s417_s18 = scalar_lea.hbm %s692_s2, 256 }
  0x62   : > { %p414_p1 = scmp.ne.s32.totalorder %s648_s27, %s413_s5  ;;  %p418_p3 = scmp.lt.u32.totalorder %s648_s27, %s692_s2 }
  0x63   : > { %p419_p4 = scmp.lt.u32.totalorder %s417_s18, %s413_s5  ;;  %p421_p6 = scmp.lt.u32.totalorder %s413_s5, %s648_s27 }
  0x64   : > { %p415_p2 = pnand %p414_p1, %p581_p8 }
  0x65   : > { %p420_p11 = por %p419_p4, %p418_p3 }
  0x66   : > { %p416_p7 = pneg %p415_p2 }
  0x67   : > { %p422_p9 = por %p421_p6, %p420_p11 }
  0x69   : > { %p423_p12 = pnand %p422_p9, %p416_p7 }
  0x6b   : > { %426 = shalt.err (!%p423_p12)
}
  0x6c   : > { %290 = dma.vmem_to_hbm [thread:$0]  (%p581_p8), %s643_s19, 128, %s648_s27, %s177_s29  }
  0x6d PF: > { %s202_s25 = sand.u32 1, %s457_s9   ;;  %p711_p13 = scmp.ne.s32.totalorder %s697_s16, 0 }
  0x6e   : > { %p712_p0 = scmp.ge.s32.totalorder %s469_s12, 2  ;;  %s203_s23 = scalar_lea.sflag [#allocation4], %s202_s25 }
  0x70   : > { %p301_p5 = pnand %p712_p0, %p711_p13 }
  0x72   : > { %452 = dma.done.wait (!%p301_p5), %s203_s23, 128  }
  0x73   : > { %454 = vsyncadd (!%p301_p5), %s203_s23, 4294967168  ;;  %p16_p10 = scmp.ge.s32.totalorder %s537_s20, 4   ;;  %s713_s9 = smov %s461_s10 }
  0x74   : > { %s714_s10 = smov %s465_s11  ;;  %s715_s11 = smov %s573_s7 }
  0x75   : > { %s716_s12 = smov %s537_s20  ;;  %18 = sbr.rel (!%p16_p10) target bundleno = 6 (0x6), region = 77 }
  0x7c   :  { %208 = vsyncpa [#allocation3], 1 }
  0x7d   :  { %210 = vsyncpa [#allocation3 + $0x1], 1 }
  0x7e   :  { %211 = vsyncpa [#allocation6], 1 }
  0x7f   :  { %212 = vsyncpa [#allocation4], 1 }
  0x80   :  { %214 = vsyncpa [#allocation4 + $0x1], 1 }

// kernel: tpu_custom_call.1
= control target key start
LH: loop header
LB: loop body
LE: loop exit
PB: predicated region body
PF: predicated region fallthrough
CT: control target
= control target key end

     0   :  { %7 = vsyncpa [#allocation3], 0  ;;  %s304_s0 = inlined_call_operand.hbm [shape: f32[2,32], index: 0, kind: input, shape index: {}]   ;;  %s305_s1 = inlined_call_operand.hbm [shape: f32[32,32], index: 1, kind: input, shape index: {}]   ;;  %s306_s2 = inlined_call_operand.hbm [shape: f32[2,32], index: 2, kind: output, shape index: {}]  }
   0x1   :  { %8 = vsyncpa [#allocation6], 0 }
   0x2   :  { %9 = vsyncpa [#allocation4], 0  ;;  %s238_s9 = smov [#allocation2]   ;;  %s239_s11 = smov [#allocation5]  }
   0x3   :  { %s16_s10 = sshll.u32 %s238_s9, 4  ;;  %s25_s12 = sshll.u32 %s239_s11, 4  ;;  %s17_s10 = int_to_ptr.vmem [resolvable:$true] %s16_s10  ;;  %s261_s12 = int_to_ptr.vmem [resolvable:$true] %s25_s12 }
   0x4   :  { %s166_s15 = scalar_lea.hbm %s304_s0, 32 }
   0x5   :  { %p167_p0 = scmp.ne.s32.totalorder %s304_s0, %s166_s15  ;;  %p170_p1 = scmp.lt.u32.totalorder %s166_s15, %s304_s0 }
   0x7   :  { %p172_p2 = pnand %p170_p1, %p167_p0 }
   0x9   :  { %175 = shalt.err (!%p172_p2)
}
   0xa   :  { %s176_s20 = scalar_lea.vmem %s17_s10, 32  ;;  %p181_p4 = scmp.lt.s32.totalorder %s17_s10, %s17_s10 }
   0xb   :  { %p177_p3 = scmp.ne.s32.totalorder %s17_s10, %s176_s20  ;;  %p182_p5 = scmp.lt.s32.totalorder %s176_s20, %s176_s20 }
   0xd   :  { %p183_p6 = por %p182_p5, %p181_p4 }
   0xf   :  { %p184_p7 = pnand %p183_p6, %p177_p3 }
  0x11   :  { %187 = shalt.err (!%p184_p7)
}
  0x12   :  { %19 = dma.hbm_to_vmem [thread:$0]  %s304_s0, 32, %s17_s10, [#allocation3]  }
  0x13   :  { %s188_s25 = scalar_lea.hbm %s305_s1, 512 }
  0x14   :  { %p189_p8 = scmp.ne.s32.totalorder %s305_s1, %s188_s25  ;;  %p192_p9 = scmp.lt.u32.totalorder %s188_s25, %s305_s1 }
  0x16   :  { %p194_p10 = pnand %p192_p9, %p189_p8 }
  0x18   :  { %197 = shalt.err (!%p194_p10)
}
  0x19   :  { %s198_s30 = scalar_lea.vmem %s261_s12, 512  ;;  %p203_p12 = scmp.lt.s32.totalorder %s261_s12, %s261_s12 }
  0x1a   :  { %p199_p11 = scmp.ne.s32.totalorder %s261_s12, %s198_s30  ;;  %p204_p13 = scmp.lt.s32.totalorder %s198_s30, %s198_s30 }
  0x1c   :  { %p205_p0 = por %p204_p13, %p203_p12 }
  0x1e   :  { %p206_p1 = pnand %p205_p0, %p199_p11 }
  0x20   :  { %209 = shalt.err (!%p206_p1)
}
  0x21   :  { %s240_s0 = smov 128   ;;  %s241_s3 = smov 8  }
  0x22   :  { %31 = dma.hbm_to_vmem [thread:$0]  %s305_s1, 512, %s261_s12, [#allocation6], %s240_s0, %s240_s0, %s241_s3  }
  0x23   :  { %232 = dma.done.wait [#allocation3], 32  }
  0x24   :  { %233 = vsyncadd [#allocation3], 4294967264 }
  0x25   :  { %234 = dma.done.wait [#allocation6], 512  }
  0x26   :  { %235 = vsyncadd [#allocation6], 4294966784  ;;  %v242_v0 = vmov 0.0|0.0   ;;  %vm243_vm0 = vmmov 0   ;;  %v244_v1 = vmov 0.0   ;;  %v39_v2 = vld [vmem:[#allocation5] sm:$0xff] }
  0x27   :  { %152 = vmatprep.subr.bf16.mxu0 %v242_v0  ;;  %149 = vmatprep.mubr.msk.f32.mxu0 %vm243_vm0, %v244_v1  ;;  %v40_v3 = vld [vmem:[#allocation5 + $0x8] sm:$0xff]  ;;  %v41_v4 = vld [vmem:[#allocation5 + $0x10] sm:$0xff]  ;;  %v42_v6 = vld [vmem:[#allocation5 + $0x18] sm:$0xff]  ;;  %vm43_vm1 = vcmask 261120   ;;  %s245_s1 = smov [#allocation7]   ;;  %vm117_vm2 = vcmask 254976  }
  0x28   :  { %v153_v5 = vpack.c.bf16 %v40_v3, %v39_v2  ;;  %v156_v7 = vpack.c.bf16 %v42_v6, %v41_v4  ;;  %v38_v8 = vld [vmem:[#allocation2] sm:$0x3]  ;;  %s125_s6 = sshll.u32 %s245_s1, 4  ;;  %s126_s6 = int_to_ptr.vmem [resolvable:$true] %s125_s6 }
  0x29   :  { %s210_s7 = scalar_lea.vmem %s126_s6, 32  ;;  %p215_p3 = scmp.lt.s32.totalorder %s126_s6, %s126_s6 }
  0x2a   :  { %154 = vmatpush3.bf16.msra.mxu0 %v153_v5  ;;  %p211_p2 = scmp.ne.s32.totalorder %s126_s6, %s210_s7  ;;  %p216_p4 = scmp.lt.s32.totalorder %s210_s7, %s210_s7 }
  0x2b   :  { %155 = vmatprep.subr.bf16.mxu0 %v242_v0 }
  0x2c   :  { %p217_p5 = por %p216_p4, %p215_p3 }
  0x2e   :  { %157 = vmatpush3.bf16.msra.mxu0 %v156_v7  ;;  %p218_p6 = pnand %p217_p5, %p211_p2 }
  0x31   :  { %150 = vmatmul.mubr.msk.f32.vlgmr.msra.gmra.mrb[0].mxu0 %vm43_vm1, %v38_v8 }
 0x104   :  { %v113_v9 = vpop.f32.mrb[0].mxu0 }
 0x105   :  { %v151_v10 = vpop.f32.mrb[1].mxu0  ;;  %118 = vst.msk [vmem:[#allocation7] sm:$0x3] %vm117_vm2, %v113_v9 }
 0x106   :  { %221 = shalt.err (!%p218_p6)
}
 0x107   :  { %s222_s10 = scalar_lea.hbm %s306_s2, 32 }
 0x108   :  { %p223_p7 = scmp.ne.s32.totalorder %s306_s2, %s222_s10  ;;  %p226_p8 = scmp.lt.u32.totalorder %s222_s10, %s306_s2 }
 0x10a   :  { %p228_p9 = pnand %p226_p8, %p223_p7 }
 0x10c   :  { %231 = shalt.err (!%p228_p9)
}
 0x10d   :  { %128 = dma.vmem_to_hbm [thread:$0]  %s126_s6, 32, %s306_s2, [#allocation4]  }
 0x10e   :  { %236 = dma.done.wait [#allocation4], 32  }
 0x10f   :  { %237 = vsyncadd [#allocation4], 4294967264 }
 0x110   :  { %132 = vsyncpa [#allocation3], 1 }
 0x111   :  { %133 = vsyncpa [#allocation6], 1 }
 0x112   :  { %134 = vsyncpa [#allocation4], 1 }

</bundles_post_ra>
